<compile_context>
chip_gen: v7x
topology: tpu7x:2x2x1
jax: 0.10.0
libtpu: 0.0.40
codegen_flags: <defaults>
</compile_context>

<pallas_src>
import functools

import jax
import jax.numpy as jnp
import numpy as np
from jax.experimental import pallas as pl
from jax.experimental.pallas import tpu as pltpu


def _mlp_norm_kernel(x_ref, w1_ref, b1_ref, w2_ref, b2_ref, scale_ref, shift_ref,
                     o_ref, *, negative_slope, l2_eps):
    # x_ref     : (Bt, D_in)   input rows
    # w1_ref    : (D_in, D_mid) first Linear weight (already transposed)
    # b1_ref    : (1, D_mid)
    # w2_ref    : (D_mid, D_out) second Linear weight (already transposed)
    # b2_ref    : (1, D_out)
    # scale_ref : (1, D_out)   BatchNorm eval-mode folded scale = gamma / sqrt(var+eps)
    # shift_ref : (1, D_out)   BatchNorm eval-mode folded shift = beta - mean*scale
    # o_ref     : (Bt, D_out)
    x = x_ref[...].astype(jnp.float32)

    # Linear 1 (MXU) + bias, Dropout = identity (eval), LeakyReLU (VPU).
    h = jnp.dot(x, w1_ref[...], preferred_element_type=jnp.float32) + b1_ref[...]
    h = jnp.where(h >= 0.0, h, negative_slope * h)

    # Linear 2 (MXU) + bias, then eval-mode BatchNorm as a per-feature affine.
    y = jnp.dot(h, w2_ref[...], preferred_element_type=jnp.float32) + b2_ref[...]
    y = y * scale_ref[...] + shift_ref[...]

    # F.normalize(p=2, dim=-1): y / max(||y||_2, eps).
    ssq = jnp.sum(y * y, axis=-1, keepdims=True)
    inv = jax.lax.rsqrt(jnp.maximum(ssq, l2_eps * l2_eps))
    o_ref[...] = (y * inv).astype(o_ref.dtype)


def mlp_norm(x, w1, b1, w2, b2, gamma, beta, running_mean, running_var,
             *, bn_eps=1e-5, negative_slope=0.01, l2_eps=1e-12, block_b=256):
    """x: (B, D_in). w1: (D_mid, D_in), w2: (D_out, D_mid) in PyTorch layout.

    Returns (B, D_out) = F.normalize(BN(LeakyReLU(x@W1.T+b1)@W2.T+b2), dim=-1).
    """
    B, D_in = x.shape
    D_mid = w1.shape[0]
    D_out = w2.shape[0]

    # Wrapper-side layout plumbing: transpose weights once so the kernel does
    # plain row-major (Bt, K) @ (K, N) MXU matmuls; fold BN into scale/shift.
    w1t = jnp.asarray(w1, jnp.float32).T                     # (D_in, D_mid)
    w2t = jnp.asarray(w2, jnp.float32).T                     # (D_mid, D_out)
    b1r = jnp.asarray(b1, jnp.float32).reshape(1, D_mid)
    b2r = jnp.asarray(b2, jnp.float32).reshape(1, D_out)
    inv_std = 1.0 / jnp.sqrt(jnp.asarray(running_var, jnp.float32) + bn_eps)
    scale = (jnp.asarray(gamma, jnp.float32) * inv_std).reshape(1, D_out)
    shift = (jnp.asarray(beta, jnp.float32)
             - jnp.asarray(running_mean, jnp.float32)
             * jnp.asarray(gamma, jnp.float32) * inv_std).reshape(1, D_out)

    # Batch tiling: big lane-dense (Bt, D_in) slabs per grid step (rows are
    # independent, so padded rows are harmless and sliced off afterwards).
    bt = B if B <= block_b else block_b
    b_pad = pl.cdiv(B, bt) * bt
    x_p = x if b_pad == B else jnp.pad(x, ((0, b_pad - B), (0, 0)))
    grid = (b_pad // bt,)

    kernel = functools.partial(
        _mlp_norm_kernel, negative_slope=negative_slope, l2_eps=l2_eps)

    out = pl.pallas_call(
        kernel,
        out_shape=jax.ShapeDtypeStruct((b_pad, D_out), x.dtype),
        grid_spec=pltpu.PrefetchScalarGridSpec(
            num_scalar_prefetch=0,
            grid=grid,
            in_specs=[
                pl.BlockSpec((bt, D_in), lambda i: (i, 0)),     # x tile
                pl.BlockSpec((D_in, D_mid), lambda i: (0, 0)),  # W1^T (resident)
                pl.BlockSpec((1, D_mid), lambda i: (0, 0)),     # b1
                pl.BlockSpec((D_mid, D_out), lambda i: (0, 0)), # W2^T (resident)
                pl.BlockSpec((1, D_out), lambda i: (0, 0)),     # b2
                pl.BlockSpec((1, D_out), lambda i: (0, 0)),     # BN scale
                pl.BlockSpec((1, D_out), lambda i: (0, 0)),     # BN shift
            ],
            out_specs=pl.BlockSpec((bt, D_out), lambda i: (i, 0)),
        ),
        compiler_params=pltpu.CompilerParams(
            dimension_semantics=("parallel",)),
    )(x_p, w1t, b1r, w2t, b2r, scale, shift)

    return out[:B]


def mlp_norm_reference(x, w1, b1, w2, b2, gamma, beta, rm, rv,
                       bn_eps=1e-5, negative_slope=0.01, l2_eps=1e-12):
    h = x @ w1.T + b1
    h = jnp.where(h >= 0.0, h, negative_slope * h)
    y = h @ w2.T + b2
    y = (y - rm) / jnp.sqrt(rv + bn_eps) * gamma + beta
    norm = jnp.sqrt(jnp.sum(y * y, axis=-1, keepdims=True))
    return y / jnp.maximum(norm, l2_eps)


if __name__ == "__main__":
    key = jax.random.PRNGKey(0)
    k = jax.random.split(key, 8)

    B, dim_inp, dim_out = 8, 256, 64
    dim_mid = min(dim_inp, dim_out)

    x = jax.random.normal(k[0], (B, dim_inp), dtype=jnp.float32)

    # PyTorch-style uniform(-1/sqrt(fan_in), 1/sqrt(fan_in)) Linear init.
    bound1 = 1.0 / np.sqrt(dim_inp)
    w1 = jax.random.uniform(k[1], (dim_mid, dim_inp), minval=-bound1,
                            maxval=bound1, dtype=jnp.float32)
    b1 = jax.random.uniform(k[2], (dim_mid,), minval=-bound1,
                            maxval=bound1, dtype=jnp.float32)
    bound2 = 1.0 / np.sqrt(dim_mid)
    w2 = jax.random.uniform(k[3], (dim_out, dim_mid), minval=-bound2,
                            maxval=bound2, dtype=jnp.float32)
    b2 = jax.random.uniform(k[4], (dim_out,), minval=-bound2,
                            maxval=bound2, dtype=jnp.float32)

    # BatchNorm1d affine params + non-trivial running statistics (eval mode).
    gamma = 1.0 + 0.1 * jax.random.normal(k[5], (dim_out,), dtype=jnp.float32)
    beta = 0.1 * jax.random.normal(k[6], (dim_out,), dtype=jnp.float32)
    running_mean = 0.1 * jax.random.normal(k[7], (dim_out,), dtype=jnp.float32)
    running_var = jnp.abs(1.0 + 0.1 * jax.random.normal(
        jax.random.PRNGKey(42), (dim_out,), dtype=jnp.float32))

    out = mlp_norm(x, w1, b1, w2, b2, gamma, beta, running_mean, running_var)
    out = jax.block_until_ready(out)

    ref = mlp_norm_reference(x, w1, b1, w2, b2, gamma, beta,
                             running_mean, running_var)
    np.testing.assert_allclose(np.asarray(out), np.asarray(ref),
                               rtol=1e-4, atol=1e-5)

    print("KERNEL_OK")
</pallas_src>

<mosaic_0001>
module attributes {stable_mosaic.version = 11 : i64} {
  func.func @_mlp_norm_kernel(%arg0: i32, %arg1: memref<8x256xf32, #tpu.memory_space<vmem>>, %arg2: memref<256x64xf32, #tpu.memory_space<vmem>>, %arg3: memref<1x64xf32, #tpu.memory_space<vmem>>, %arg4: memref<64x64xf32, #tpu.memory_space<vmem>>, %arg5: memref<1x64xf32, #tpu.memory_space<vmem>>, %arg6: memref<1x64xf32, #tpu.memory_space<vmem>>, %arg7: memref<1x64xf32, #tpu.memory_space<vmem>>, %arg8: memref<8x64xf32, #tpu.memory_space<vmem>>) attributes {dimension_semantics = [#tpu.dimension_semantics<parallel>], iteration_bounds = array<i64: 1>, scalar_prefetch = 0 : i64, scratch_operands = 0 : i64, tpu.core_type = #tpu.core_type<tc>, window_params = [{transform_indices = @transform_0, window_bounds = array<i64: 8, 256>}, {pipeline_mode = #tpu.pipeline_mode<synchronous>, transform_indices = @transform_1, window_bounds = array<i64: 256, 64>}, {pipeline_mode = #tpu.pipeline_mode<synchronous>, transform_indices = @transform_2, window_bounds = array<i64: 1, 64>}, {pipeline_mode = #tpu.pipeline_mode<synchronous>, transform_indices = @transform_3, window_bounds = array<i64: 64, 64>}, {pipeline_mode = #tpu.pipeline_mode<synchronous>, transform_indices = @transform_4, window_bounds = array<i64: 1, 64>}, {pipeline_mode = #tpu.pipeline_mode<synchronous>, transform_indices = @transform_5, window_bounds = array<i64: 1, 64>}, {pipeline_mode = #tpu.pipeline_mode<synchronous>, transform_indices = @transform_6, window_bounds = array<i64: 1, 64>}, {transform_indices = @transform_7, window_bounds = array<i64: 8, 64>}]} {
    %c0 = arith.constant 0 : index
    %c0_0 = arith.constant 0 : index
    %0 = vector.load %arg1[%c0, %c0_0] : memref<8x256xf32, #tpu.memory_space<vmem>>, vector<8x256xf32>
    %c0_1 = arith.constant 0 : index
    %c0_2 = arith.constant 0 : index
    %1 = vector.load %arg2[%c0_1, %c0_2] : memref<256x64xf32, #tpu.memory_space<vmem>>, vector<256x64xf32>
    %cst = arith.constant dense<0.000000e+00> : vector<8x64xf32>
    %2 = tpu.matmul %0, %1, %cst {dimension_numbers = #tpu.dot_dimension_numbers<[1], [0], [0], [1], [0, 0, 1, 1], [], []>} : vector<8x256xf32>, vector<256x64xf32>, vector<8x64xf32> -> vector<8x64xf32>
    %c0_3 = arith.constant 0 : index
    %c0_4 = arith.constant 0 : index
    %3 = vector.load %arg3[%c0_3, %c0_4] : memref<1x64xf32, #tpu.memory_space<vmem>>, vector<1x64xf32>
    %4 = vector.broadcast %3 : vector<1x64xf32> to vector<8x64xf32>
    %5 = arith.addf %2, %4 : vector<8x64xf32>
    %cst_5 = arith.constant 0.000000e+00 : f32
    %6 = vector.broadcast %cst_5 : f32 to vector<8x64xf32>
    %7 = arith.cmpf oge, %5, %6 : vector<8x64xf32>
    %cst_6 = arith.constant 0.00999999977 : f32
    %8 = vector.broadcast %cst_6 : f32 to vector<8x64xf32>
    %9 = arith.mulf %8, %5 : vector<8x64xf32>
    %10 = arith.select %7, %5, %9 : vector<8x64xi1>, vector<8x64xf32>
    %c0_7 = arith.constant 0 : index
    %c0_8 = arith.constant 0 : index
    %11 = vector.load %arg4[%c0_7, %c0_8] : memref<64x64xf32, #tpu.memory_space<vmem>>, vector<64x64xf32>
    %cst_9 = arith.constant dense<0.000000e+00> : vector<8x64xf32>
    %12 = tpu.matmul %10, %11, %cst_9 {dimension_numbers = #tpu.dot_dimension_numbers<[1], [0], [0], [1], [0, 0, 1, 1], [], []>} : vector<8x64xf32>, vector<64x64xf32>, vector<8x64xf32> -> vector<8x64xf32>
    %c0_10 = arith.constant 0 : index
    %c0_11 = arith.constant 0 : index
    %13 = vector.load %arg5[%c0_10, %c0_11] : memref<1x64xf32, #tpu.memory_space<vmem>>, vector<1x64xf32>
    %14 = vector.broadcast %13 : vector<1x64xf32> to vector<8x64xf32>
    %15 = arith.addf %12, %14 : vector<8x64xf32>
    %c0_12 = arith.constant 0 : index
    %c0_13 = arith.constant 0 : index
    %16 = vector.load %arg6[%c0_12, %c0_13] : memref<1x64xf32, #tpu.memory_space<vmem>>, vector<1x64xf32>
    %17 = vector.broadcast %16 : vector<1x64xf32> to vector<8x64xf32>
    %18 = arith.mulf %15, %17 : vector<8x64xf32>
    %c0_14 = arith.constant 0 : index
    %c0_15 = arith.constant 0 : index
    %19 = vector.load %arg7[%c0_14, %c0_15] : memref<1x64xf32, #tpu.memory_space<vmem>>, vector<1x64xf32>
    %20 = vector.broadcast %19 : vector<1x64xf32> to vector<8x64xf32>
    %21 = arith.addf %18, %20 : vector<8x64xf32>
    %22 = arith.mulf %21, %21 : vector<8x64xf32>
    %cst_16 = arith.constant dense<0.000000e+00> : vector<8xf32>
    %23 = vector.multi_reduction <add>, %22, %cst_16 [1] : vector<8x64xf32> to vector<8xf32>
    %24 = vector.shape_cast %23 : vector<8xf32> to vector<8x1xf32>
    %cst_17 = arith.constant 1.000000e-24 : f32
    %25 = vector.broadcast %cst_17 : f32 to vector<8x1xf32>
    %26 = arith.maximumf %24, %25 : vector<8x1xf32>
    %27 = math.rsqrt %26 : vector<8x1xf32>
    %28 = vector.broadcast %27 : vector<8x1xf32> to vector<8x64xf32>
    %29 = arith.mulf %21, %28 : vector<8x64xf32>
    %c0_18 = arith.constant 0 : index
    %c0_19 = arith.constant 0 : index
    %30 = vector.load %arg8[%c0_18, %c0_19] : memref<8x64xf32, #tpu.memory_space<vmem>>, vector<8x64xf32>
    tpu.vector_store %arg8[%c0_18, %c0_19], %29 {strides = array<i32>} : memref<8x64xf32, #tpu.memory_space<vmem>>, vector<8x64xf32>,
    return
  }
  func.func @transform_0(%arg0: i32) -> (i32, i32) {
    %c0_i32 = arith.constant 0 : i32
    %c0_i32_0 = arith.constant 0 : i32
    return %arg0, %c0_i32 : i32, i32
  }
  func.func @transform_1(%arg0: i32) -> (i32, i32) {
    %c0_i32 = arith.constant 0 : i32
    %c0_i32_0 = arith.constant 0 : i32
    %c0_i32_1 = arith.constant 0 : i32
    return %c0_i32, %c0_i32_0 : i32, i32
  }
  func.func @transform_2(%arg0: i32) -> (i32, i32) {
    %c0_i32 = arith.constant 0 : i32
    %c0_i32_0 = arith.constant 0 : i32
    %c0_i32_1 = arith.constant 0 : i32
    return %c0_i32, %c0_i32_0 : i32, i32
  }
  func.func @transform_3(%arg0: i32) -> (i32, i32) {
    %c0_i32 = arith.constant 0 : i32
    %c0_i32_0 = arith.constant 0 : i32
    %c0_i32_1 = arith.constant 0 : i32
    return %c0_i32, %c0_i32_0 : i32, i32
  }
  func.func @transform_4(%arg0: i32) -> (i32, i32) {
    %c0_i32 = arith.constant 0 : i32
    %c0_i32_0 = arith.constant 0 : i32
    %c0_i32_1 = arith.constant 0 : i32
    return %c0_i32, %c0_i32_0 : i32, i32
  }
  func.func @transform_5(%arg0: i32) -> (i32, i32) {
    %c0_i32 = arith.constant 0 : i32
    %c0_i32_0 = arith.constant 0 : i32
    %c0_i32_1 = arith.constant 0 : i32
    return %c0_i32, %c0_i32_0 : i32, i32
  }
  func.func @transform_6(%arg0: i32) -> (i32, i32) {
    %c0_i32 = arith.constant 0 : i32
    %c0_i32_0 = arith.constant 0 : i32
    %c0_i32_1 = arith.constant 0 : i32
    return %c0_i32, %c0_i32_0 : i32, i32
  }
  func.func @transform_7(%arg0: i32) -> (i32, i32) {
    %c0_i32 = arith.constant 0 : i32
    %c0_i32_0 = arith.constant 0 : i32
    return %arg0, %c0_i32 : i32, i32
  }
}

</mosaic_0001>

<bundles_post_ra>
// kernel: tpu_custom_call.1
= control target key start
LH: loop header
LB: loop body
LE: loop exit
PB: predicated region body
PF: predicated region fallthrough
CT: control target
= control target key end

     0   :  { %v410_v7 = vmov 0.0|0.0   ;;  %s611_s0 = inlined_call_operand.vmem [shape: f32[8,256], index: 0, kind: input, shape index: {}]   ;;  %s612_s1 = inlined_call_operand.vmem [shape: f32[256,64], index: 1, kind: input, shape index: {}]   ;;  %s613_s2 = inlined_call_operand.vmem [shape: f32[1,64], index: 2, kind: input, shape index: {}]   ;;  %s614_s3 = inlined_call_operand.vmem [shape: f32[64,64], index: 3, kind: input, shape index: {}]   ;;  %s615_s4 = inlined_call_operand.vmem [shape: f32[1,64], index: 4, kind: input, shape index: {}]   ;;  %s616_s5 = inlined_call_operand.vmem [shape: f32[1,64], index: 5, kind: input, shape index: {}]   ;;  %s617_s6 = inlined_call_operand.vmem [shape: f32[1,64], index: 6, kind: input, shape index: {}]   ;;  %s618_s7 = inlined_call_operand.hbm [shape: f32[8,64], index: 7, kind: output, shape index: {}]  }
   0x1   :  { %v45_v0 = vld [vmem:[%s612_s1 + $0x80] sm:$0xff]  ;;  %v46_v1 = vld [vmem:[%s612_s1 + $0x88] sm:$0xff]  ;;  %v47_v5 = vld [vmem:[%s612_s1 + $0x90] sm:$0xff]  ;;  %368 = vmatprep.subr.bf16.mxu1 %v410_v7 }
   0x2   :  { %v29_v2 = vld [vmem:[%s612_s1] sm:$0xff]  ;;  %v336_v3 = vpack.c.bf16 %v46_v1, %v45_v0  ;;  %v30_v4 = vld [vmem:[%s612_s1 + $0x8] sm:$0xff]  ;;  %v48_v6 = vld [vmem:[%s612_s1 + $0x98] sm:$0xff] }
   0x3   :  { %v338_v8 = vpack.c.bf16 %v30_v4, %v29_v2  ;;  %v340_v9 = vpack.c.bf16 %v48_v6, %v47_v5  ;;  %v31_v10 = vld [vmem:[%s612_s1 + $0x10] sm:$0xff]  ;;  %v32_v11 = vld [vmem:[%s612_s1 + $0x18] sm:$0xff]  ;;  %v49_v12 = vld [vmem:[%s612_s1 + $0xa0] sm:$0xff] }
   0x4   :  { %337 = vmatprep.subr.bf16.mxu0 %v336_v3  ;;  %v50_v13 = vld [vmem:[%s612_s1 + $0xa8] sm:$0xff]  ;;  %v342_v14 = vpack.c.bf16 %v32_v11, %v31_v10  ;;  %v33_v16 = vld [vmem:[%s612_s1 + $0x20] sm:$0xff]  ;;  %v51_v18 = vld [vmem:[%s612_s1 + $0xb0] sm:$0xff] }
   0x5   :  { %339 = vmatpush3.bf16.msra.mxu0 %v338_v8  ;;  %v344_v15 = vpack.c.bf16 %v50_v13, %v49_v12  ;;  %v34_v17 = vld [vmem:[%s612_s1 + $0x28] sm:$0xff]  ;;  %v52_v19 = vld [vmem:[%s612_s1 + $0xb8] sm:$0xff]  ;;  %v35_v22 = vld [vmem:[%s612_s1 + $0x30] sm:$0xff] }
   0x6   :  { %341 = vmatprep.subr.bf16.mxu0 %v340_v9  ;;  %v346_v20 = vpack.c.bf16 %v34_v17, %v33_v16  ;;  %v348_v21 = vpack.c.bf16 %v52_v19, %v51_v18  ;;  %v36_v23 = vld [vmem:[%s612_s1 + $0x38] sm:$0xff]  ;;  %v53_v24 = vld [vmem:[%s612_s1 + $0xc0] sm:$0xff]  ;;  %v54_v25 = vld [vmem:[%s612_s1 + $0xc8] sm:$0xff] }
   0x7   :  { %v28_v26 = vld [vmem:[%s611_s0 + $0x8] sm:$0xff]  ;;  %v141_v27 = vld [vmem:[%s614_s3] sm:$0xff]  ;;  %v350_v29 = vpack.c.bf16 %v36_v23, %v35_v22  ;;  %v143_v31 = vld [vmem:[%s614_s3 + $0x10] sm:$0xff] }
   0x8   :  { %132 = vmatprep.mubr.f32.mxu0 %v28_v26  ;;  %v142_v28 = vld [vmem:[%s614_s3 + $0x8] sm:$0xff]  ;;  %v144_v32 = vld [vmem:[%s614_s3 + $0x18] sm:$0xff] }
   0x9   :  { %343 = vmatpush3.bf16.msra.mxu0 %v342_v14  ;;  %v369_v30 = vpack.c.bf16 %v142_v28, %v141_v27 }
   0xa   :  { %345 = vmatprep.subr.bf16.mxu0 %v344_v15 }
   0xd   :  { %347 = vmatpush3.bf16.msra.mxu0 %v346_v20 }
   0xe   :  { %12 = vsyncpa [#allocation3], 0  ;;  %349 = vmatprep.subr.bf16.mxu0 %v348_v21  ;;  %v352_v33 = vpack.c.bf16 %v54_v25, %v53_v24  ;;  %v37_v34 = vld [vmem:[%s612_s1 + $0x40] sm:$0xff]  ;;  %v38_v35 = vld [vmem:[%s612_s1 + $0x48] sm:$0xff]  ;;  %370 = vmatpush3.bf16.msra.mxu1 %v369_v30  ;;  %v372_v38 = vpack.c.bf16 %v144_v32, %v143_v31  ;;  %vm411_vm0 = vmmov 0   ;;  %v412_v63 = vmov 0.0  }
   0xf   :  { %v55_v36 = vld [vmem:[%s612_s1 + $0xd0] sm:$0xff]  ;;  %v56_v37 = vld [vmem:[%s612_s1 + $0xd8] sm:$0xff]  ;;  %371 = vmatprep.subr.bf16.mxu1 %v410_v7  ;;  %v354_v39 = vpack.c.bf16 %v38_v35, %v37_v34  ;;  %v57_v43 = vld [vmem:[%s612_s1 + $0xe0] sm:$0xff]  ;;  %333 = vmatprep.mubr.msk.f32.mxu1 %vm411_vm0, %v412_v63  ;;  %vm156_vm2 = vcmask 523264  }
  0x10   :  { %v356_v40 = vpack.c.bf16 %v56_v37, %v55_v36  ;;  %v39_v41 = vld [vmem:[%s612_s1 + $0x50] sm:$0xff]  ;;  %v40_v42 = vld [vmem:[%s612_s1 + $0x58] sm:$0xff]  ;;  %v58_v44 = vld [vmem:[%s612_s1 + $0xe8] sm:$0xff] }
  0x11   :  { %351 = vmatpush3.bf16.msra.mxu0 %v350_v29  ;;  %v358_v45 = vpack.c.bf16 %v40_v42, %v39_v41  ;;  %v360_v46 = vpack.c.bf16 %v58_v44, %v57_v43  ;;  %v41_v47 = vld [vmem:[%s612_s1 + $0x60] sm:$0xff]  ;;  %v42_v48 = vld [vmem:[%s612_s1 + $0x68] sm:$0xff]  ;;  %v59_v49 = vld [vmem:[%s612_s1 + $0xf0] sm:$0xff] }
  0x12   :  { %353 = vmatprep.subr.bf16.mxu0 %v352_v33  ;;  %373 = vmatpush3.bf16.msra.mxu1 %v372_v38  ;;  %v60_v50 = vld [vmem:[%s612_s1 + $0xf8] sm:$0xff]  ;;  %v362_v51 = vpack.c.bf16 %v42_v48, %v41_v47  ;;  %v43_v53 = vld [vmem:[%s612_s1 + $0x70] sm:$0xff]  ;;  %v27_v56 = vld [vmem:[%s611_s0] sm:$0xff] }
  0x13   :  { %374 = vmatprep.subr.bf16.mxu1 %v410_v7  ;;  %v364_v52 = vpack.c.bf16 %v60_v50, %v59_v49  ;;  %v44_v54 = vld [vmem:[%s612_s1 + $0x78] sm:$0xff]  ;;  %v145_v57 = vld [vmem:[%s614_s3 + $0x20] sm:$0xff]  ;;  %v146_v58 = vld [vmem:[%s614_s3 + $0x28] sm:$0xff] }
  0x14   :  { %v366_v55 = vpack.c.bf16 %v44_v54, %v43_v53  ;;  %v375_v59 = vpack.c.bf16 %v146_v58, %v145_v57  ;;  %v147_v60 = vld [vmem:[%s614_s3 + $0x30] sm:$0xff]  ;;  %v148_v61 = vld [vmem:[%s614_s3 + $0x38] sm:$0xff]  ;;  %v268_v1 = vld [vmem:[%s613_s2] ss:$0 sm:$0xff] }
  0x15   :  { %355 = vmatpush3.bf16.msra.mxu0 %v354_v39  ;;  %v378_v62 = vpack.c.bf16 %v148_v61, %v147_v60  ;;  %v271_v9 = vld [vmem:[%s616_s5] ss:$0 sm:$0xff] }
  0x16   :  { %357 = vmatprep.subr.bf16.mxu0 %v356_v40  ;;  %376 = vmatpush3.bf16.msra.mxu1 %v375_v59  ;;  %v272_v12 = vld [vmem:[%s617_s6] ss:$0 sm:$0xff] }
  0x17   :  { %377 = vmatprep.subr.bf16.mxu1 %v410_v7  ;;  %v269_v7 = vld [vmem:[%s615_s4] ss:$0 sm:$0xff]  ;;  %s413_s4 = smov [#allocation2]  }
  0x18   :  { %s260_s20 = sshll.u32 %s413_s4, 4  ;;  %s261_s20 = int_to_ptr.vmem [resolvable:$true] %s260_s20 }
  0x19   :  { %359 = vmatpush3.bf16.msra.mxu0 %v358_v45  ;;  %s386_s5 = scalar_lea.vmem %s261_s20, 128  ;;  %p391_p1 = scmp.lt.s32.totalorder %s261_s20, %s261_s20 }
  0x1a   :  { %361 = vmatprep.subr.bf16.mxu0 %v360_v46  ;;  %379 = vmatpush3.bf16.msra.mxu1 %v378_v62  ;;  %p387_p0 = scmp.ne.s32.totalorder %s261_s20, %s386_s5  ;;  %p392_p2 = scmp.lt.s32.totalorder %s386_s5, %s386_s5 }
  0x1c   :  { %p393_p3 = por %p392_p2, %p391_p1 }
  0x1d   :  { %363 = vmatpush3.bf16.msra.mxu0 %v362_v51 }
  0x1e   :  { %365 = vmatprep.subr.bf16.mxu0 %v364_v52  ;;  %p394_p4 = pnand %p393_p3, %p387_p0 }
  0x21   :  { %367 = vmatpush3.bf16.msra.mxu0 %v366_v55 }
  0x24   :  { %133 = vmatmul.mubr.f32.vlgmr.msra.gmra.mrb[0].mxu0 %v27_v56 }
  0xf7   :  { %v305_v0 = vpop.f32.mrb[0].mxu0 }
  0xf8   :  { %v306_v2 = vpop.f32.mrb[1].mxu0 }
  0xf9   :  { %v307_v3 = vadd.f32 %v306_v2, %v305_v0 }
  0xfb   :  { %v135_v4 = vadd.f32 %v307_v3, %v268_v1 }
  0xfd   :  { %v139_v5 = vmul.f32 0.01, %v135_v4  ;;  %vm138_vm1 = vcmp.ge.f32.partialorder %v135_v4, 0.0 }
  0xff   :  { %v140_v6 = vsel %vm138_vm1, %v135_v4, %v139_v5 }
 0x100   :  { %334 = vmatmul.mubr.msk.f32.vlgmr.msra.gmra.mrb[0].mxu1 %vm156_vm2, %v140_v6 }
 0x1d3   :  { %v226_v8 = vpop.f32.mrb[0].mxu1 }
 0x1d4   :  { %v227_v10 = vadd.f32 %v269_v7, %v226_v8  ;;  %v335_v11 = vpop.f32.mrb[1].mxu1 }
 0x1d6   :  { %v237_v13 = vmul.f32 %v271_v9, %v227_v10 }
 0x1d8   :  { %v245_v14 = vadd.f32 %v272_v12, %v237_v13 }
 0x1da   :  { %v246_v15 = vmul.f32 %v245_v14, %v245_v14 }
 0x1dc   :  { %v247_v16 = vsel %vm156_vm2, %v246_v15, 0.0 }
 0x1dd   :  { %248 = vadd.xlane.f32.xlu0 %v247_v16 }
 0x26a   :  { %v249_v17 = vpop.xlane.xlu0 %248 }
 0x26b   :  { %v250_v18 = vmax.f32 %v249_v17, 1e-24 }
 0x26d   :  { %384 = vrsqrt.f32 %v250_v18 }
 0x277   :  { %v385_v19 = vpop.eup %384 }
 0x278   :  { %v252_v20 = vmul.f32 %v385_v19, %v245_v14 }
 0x27a   :  { %253 = vst.msk [vmem:[#allocation2] sm:$0xff] %vm156_vm2, %v252_v20 }
 0x27b   :  { %397 = shalt.err (!%p394_p4)
}
 0x27c   :  { %s398_s22 = scalar_lea.hbm %s618_s7, 128 }
 0x27d   :  { %p399_p5 = scmp.ne.s32.totalorder %s618_s7, %s398_s22  ;;  %p402_p6 = scmp.lt.u32.totalorder %s398_s22, %s618_s7 }
 0x27f   :  { %p404_p7 = pnand %p402_p6, %p399_p5 }
 0x281   :  { %407 = shalt.err (!%p404_p7)
}
 0x282   :  { %263 = dma.vmem_to_hbm [thread:$0]  %s261_s20, 128, %s618_s7, [#allocation3]  }
 0x283   :  { %408 = dma.done.wait [#allocation3], 128  }
 0x284   :  { %409 = vsyncadd [#allocation3], 4294967168 }
 0x285   :  { %267 = vsyncpa [#allocation3], 1 }

</bundles_post_ra>
